<compile_context>
chip_gen: v5e
topology: v5e:2x2
jax: 0.10.0
libtpu: 0.0.40
codegen_flags: <defaults>
</compile_context>

<pallas_src>
import functools
import math

import jax
import jax.numpy as jnp
from jax.experimental import pallas as pl
from jax.experimental.pallas import tpu as pltpu


# -----------------------------------------------------------------------------
# Helpers
# -----------------------------------------------------------------------------
def _round_up(v, m):
    return ((v + m - 1) // m) * m


@functools.lru_cache(maxsize=1)
def _vmem_limit():
    """Generation-aware scoped-VMEM budget: 3/4 of physical, capped at 100 MiB."""
    cap = 64 * 1024 * 1024
    try:
        info = pltpu.get_tpu_info()
        cap = int(getattr(info, "vmem_capacity_bytes", cap) or cap)
    except Exception:
        pass
    return int(min(100 * 1024 * 1024, cap * 3 // 4))


def _pick_m_tile(m):
    """Row-tile for the matmul path: sublane-aligned, <= 1024, and >= 2 grid
    steps whenever m > 256 (keeps both v7x TensorCores / megacore busy)."""
    if m <= 256:
        return m                              # == full dim, always legal
    return min(1024, _round_up(pl.cdiv(m, 2), 8))


def _pick_cout_tile(cout):
    """Output-channel tile: whole Cout when small (lane block == full dim is
    always legal); otherwise the largest of 512/256/128 dividing Cout so the
    weight/output blocks stay VMEM-bounded and stores stay lane-dense."""
    if cout <= 512:
        return cout
    for t in (512, 256, 128):
        if cout % t == 0:
            return t
    # TODO(synk): Cout > 512 and not a multiple of 128 -> whole-Cout block
    # (correct but VMEM-heavy; such channel counts do not occur in TransUNet2).
    return cout


def _fold_bn(bn):
    scale = bn["gamma"] / jnp.sqrt(bn["var"] + bn["eps"])
    shift = bn["beta"] - bn["mean"] * scale
    return scale.astype(jnp.float32), shift.astype(jnp.float32)


def _act_to_relu(act):
    if act is True or (isinstance(act, str) and act.lower() == "relu"):
        return True
    if act is False or act is None or (
            isinstance(act, str) and act.lower() in ("identity", "none")):
        return False
    # TODO(synk): arbitrary activation nn.Modules/callables are not representable here.
    raise NotImplementedError(f"unsupported activation spec: {act!r}")


# -----------------------------------------------------------------------------
# Kernel 1: matmul (x @ w) + folded BN + activation
# Used for 1x1 convs and for the small-Cin fat-K (im2col) k x k path.
# -----------------------------------------------------------------------------
def _matmul_bn_act_kernel(x_ref, w_ref, s_ref, b_ref, o_ref, *, relu):
    # x_ref: (tm, K) bf16, w_ref: (K, tco) bf16, s_ref/b_ref: (1, tco) f32,
    # o_ref: (tm, tco) bf16
    acc = jnp.dot(x_ref[...], w_ref[...], preferred_element_type=jnp.float32)
    acc = acc * s_ref[...] + b_ref[...]
    if relu:
        acc = jnp.maximum(acc, 0.0)
    o_ref[...] = acc.astype(o_ref.dtype)


def _matmul_bn_act(x, w, scale, shift, *, relu):
    """x: (..., K) bf16, w: (K, Cout) bf16 -> (..., Cout) bf16."""
    lead = x.shape[:-1]
    K = x.shape[-1]
    Cout = w.shape[1]
    M = math.prod(lead)
    xm = x.reshape(M, K)

    tm = _pick_m_tile(M)
    tco = _pick_cout_tile(Cout)
    grid = (pl.cdiv(M, tm), Cout // tco)      # ragged last M block handled by Pallas

    out = pl.pallas_call(
        functools.partial(_matmul_bn_act_kernel, relu=relu),
        out_shape=jax.ShapeDtypeStruct((M, Cout), jnp.bfloat16),
        grid=grid,
        in_specs=[
            pl.BlockSpec((tm, K), lambda i, j: (i, 0)),
            pl.BlockSpec((K, tco), lambda i, j: (0, j)),
            pl.BlockSpec((1, tco), lambda i, j: (0, j)),
            pl.BlockSpec((1, tco), lambda i, j: (0, j)),
        ],
        out_specs=pl.BlockSpec((tm, tco), lambda i, j: (i, j)),
        compiler_params=pltpu.CompilerParams(
            dimension_semantics=("parallel", "parallel"),
            vmem_limit_bytes=_vmem_limit()),
    )(xm, w, scale.reshape(1, Cout), shift.reshape(1, Cout))
    return out.reshape(*lead, Cout)


# -----------------------------------------------------------------------------
# Kernel 2: k x k conv (stride 1) + folded BN + activation, large-Cin path.
# M = Hp*Wp matmuls over k*k statically shifted slices of the flattened
# zero-padded image; one lane-dense bf16 store.
# -----------------------------------------------------------------------------
def _convkxk_bn_act_kernel(x_ref, w_ref, s_ref, b_ref, o_ref, *, k, cin, Wp, Lp, relu):
    # x_ref: (1, Ltot, Cin) bf16 flattened zero-padded image (trailing rows = zeros)
    # w_ref: (k*k*Cin, tco) bf16, s_ref/b_ref: (1, tco) f32, o_ref: (1, Lp, tco) bf16
    def tap(t):
        dy, dx = divmod(t, k)
        # Static shift of the flat image.  NOTE: offsets are not sublane-aligned;
        # TODO(synk): if the Mosaic dump shows per-tap realignment copies, handle
        # the dx shift with pltpu.roll (wrapped rows land in the discarded border).
        return x_ref[0, pl.ds(dy * Wp + dx, Lp), :]

    # Initialise the accumulator from tap 0 (saves a zero-fill + add pass).
    acc = jnp.dot(tap(0), w_ref[pl.ds(0, cin), :], preferred_element_type=jnp.float32)
    for t in range(1, k * k):
        acc += jnp.dot(tap(t), w_ref[pl.ds(t * cin, cin), :],
                       preferred_element_type=jnp.float32)
    acc = acc * s_ref[...] + b_ref[...]
    if relu:
        acc = jnp.maximum(acc, 0.0)
    o_ref[0, :, :] = acc.astype(o_ref.dtype)          # single lane-dense bf16 store


def _convkxk_bn_act(x, w, scale, shift, *, k, pad, relu):
    """Stride-1 k x k conv + BN + act on the zero-padded grid.
    x: (N,H,W,Cin) bf16, w: (k*k*Cin,Cout) bf16 -> (N, Hp*Wp, Cout) bf16.
    Border rows/cols of the padded grid contain garbage (finite, since inputs are
    finite bf16) and must be sliced off by the caller."""
    N, H, W, Cin = x.shape
    Cout = w.shape[1]
    Hp, Wp = H + 2 * pad, W + 2 * pad
    assert Wp >= k - 1 and Hp >= k - 1
    Lp = Hp * Wp

    # Single merged pad: conv halo + k extra bottom rows, which after flattening
    # provide >= (k-1)*(Wp+1) trailing zeros so every shifted tap slice is in
    # bounds.  (No second full-activation pad pass.)
    xf = jnp.pad(x, ((0, 0), (pad, pad + k), (pad, pad), (0, 0)))
    Ltot = (Hp + k) * Wp
    xf = xf.reshape(N, Ltot, Cin)                     # dim-merge reshape: free

    tco = _pick_cout_tile(Cout)
    grid = (N, Cout // tco)                           # both axes parallel

    # TODO(synk): for very large spatial *and* large Cin on v7x (64 MiB VMEM),
    # add a row-block grid axis with a (k-1)-row halo; in TransUNet2 the
    # large-spatial layers have small Cin and go through the M-tiled fat-K
    # matmul path instead, so whole-image blocks are fine here.
    out = pl.pallas_call(
        functools.partial(_convkxk_bn_act_kernel, k=k, cin=Cin, Wp=Wp, Lp=Lp, relu=relu),
        out_shape=jax.ShapeDtypeStruct((N, Lp, Cout), jnp.bfloat16),
        grid=grid,
        in_specs=[
            pl.BlockSpec((1, Ltot, Cin), lambda n, j: (n, 0, 0)),
            pl.BlockSpec((k * k * Cin, tco), lambda n, j: (0, j)),
            pl.BlockSpec((1, tco), lambda n, j: (0, j)),
            pl.BlockSpec((1, tco), lambda n, j: (0, j)),
        ],
        out_specs=pl.BlockSpec((1, Lp, tco), lambda n, j: (n, 0, j)),
        compiler_params=pltpu.CompilerParams(
            dimension_semantics=("parallel", "parallel"),
            vmem_limit_bytes=_vmem_limit()),
    )(xf, w, scale.reshape(1, Cout), shift.reshape(1, Cout))
    return out


# -----------------------------------------------------------------------------
# ConvModule wrappers
# -----------------------------------------------------------------------------
def conv_module_forward_nhwc(params, x_nhwc, *, k=1, s=1, p=0, g=1, act=True):
    """act(bn(conv(x))) on an NHWC input; returns NHWC bf16.
    Keep NHWC between chained ConvModules and only transpose at the model boundary."""
    if g != 1:
        # TODO(synk): grouped convolution (g > 1) not implemented in the Pallas path.
        raise NotImplementedError("groups != 1 not supported")
    relu = _act_to_relu(act)

    scale, shift = _fold_bn(params["bn"])
    w = params["w"]                                   # (Cout, Cin, k, k), PyTorch OIHW
    Cout, Cin = w.shape[0], w.shape[1]
    assert x_nhwc.shape[-1] == Cin
    x = x_nhwc.astype(jnp.bfloat16)

    if k == 1:
        if p:
            x = jnp.pad(x, ((0, 0), (p, p), (p, p), (0, 0)))
        if s > 1:
            x = x[:, ::s, ::s, :]                     # stride folded before the matmul
        w1 = jnp.transpose(w.reshape(Cout, Cin), (1, 0)).astype(jnp.bfloat16)
        return _matmul_bn_act(x, w1, scale, shift, relu=relu)

    # k x k conv.  Weight as one (k*k*Cin, Cout) matrix, K ordered (dy, dx, cin).
    wk = jnp.transpose(w, (2, 3, 1, 0)).reshape(k * k * Cin, Cout).astype(jnp.bfloat16)
    N, H, W, _ = x.shape
    Ho = (H + 2 * p - k) // s + 1
    Wo = (W + 2 * p - k) // s + 1
    assert Ho > 0 and Wo > 0

    if Cin * k * k <= 256:
        # Small-Cin fat-K path: one wide-K matmul instead of k*k skinny-K matmuls
        # plus k*k f32 accumulator passes.  Strided tap slices fold the stride and
        # leave no garbage border.  The im2col buffer is tiny here (<= 256 bf16
        # channels), so the extra wrapper pass is negligible vs. output writeback.
        xp = x if p == 0 else jnp.pad(x, ((0, 0), (p, p), (p, p), (0, 0)))
        taps = [xp[:, dy:dy + (Ho - 1) * s + 1:s, dx:dx + (Wo - 1) * s + 1:s, :]
                for dy in range(k) for dx in range(k)]
        xim = jnp.concatenate(taps, axis=-1)          # (N, Ho, Wo, k*k*Cin) bf16
        return _matmul_bn_act(xim, wk, scale, shift, relu=relu)

    # Large-Cin path: flattened padded-grid Pallas kernel (stride-1 compute).
    y = _convkxk_bn_act(x, wk, scale, shift, k=k, pad=p, relu=relu)
    Hp, Wp = H + 2 * p, W + 2 * p
    y = y.reshape(N, Hp, Wp, Cout)
    # Drop the garbage border and fold the stride in a single bf16 slice.
    # TODO(synk): for s > 1 this path still computes the stride-1 output and
    # subsamples; fold the stride into the kernel for large-Cin strided convs.
    return y[:, 0:(Ho - 1) * s + 1:s, 0:(Wo - 1) * s + 1:s, :]


def conv_module_forward(params, x_nchw, *, k=1, s=1, p=0, g=1, act=True):
    """PyTorch-layout forward: NCHW f32 in -> NCHW f32 out.
    Transposes only at the module boundary; prefer conv_module_forward_nhwc when
    chaining ConvModules."""
    x = jnp.transpose(x_nchw, (0, 2, 3, 1))
    y = conv_module_forward_nhwc(params, x, k=k, s=s, p=p, g=g, act=act)
    return jnp.transpose(y, (0, 3, 1, 2)).astype(jnp.float32)


# -----------------------------------------------------------------------------
# Deterministic parameters (PyTorch-default-style conv init, non-trivial BN stats)
# -----------------------------------------------------------------------------
def make_conv_module_params(key, c1, c2, k=1, eps=1e-3):
    kw, kg, kb, km, kv = jax.random.split(key, 5)
    fan_in = c1 * k * k
    bound = 1.0 / math.sqrt(fan_in)
    w = jax.random.uniform(kw, (c2, c1, k, k), jnp.float32, -bound, bound)
    bn = {
        "gamma": jax.random.uniform(kg, (c2,), jnp.float32, 0.5, 1.5),
        "beta": jax.random.uniform(kb, (c2,), jnp.float32, -0.5, 0.5),
        "mean": 0.1 * jax.random.normal(km, (c2,), jnp.float32),
        "var": jax.random.uniform(kv, (c2,), jnp.float32, 0.5, 1.5),
        "eps": jnp.float32(eps),
    }
    return {"w": w, "bn": bn}


def _reference_forward(params, x_nchw, *, k, s, p, act=True):
    """Pure-JAX reference with the same bf16 input/weight quantization, f32 accum."""
    scale, shift = _fold_bn(params["bn"])
    xq = x_nchw.astype(jnp.bfloat16).astype(jnp.float32)
    wq = params["w"].astype(jnp.bfloat16).astype(jnp.float32)
    y = jax.lax.conv_general_dilated(
        xq, wq, window_strides=(s, s), padding=[(p, p), (p, p)],
        dimension_numbers=("NCHW", "OIHW", "NCHW"),
        preferred_element_type=jnp.float32)
    y = y * scale[None, :, None, None] + shift[None, :, None, None]
    if act is True:
        y = jnp.maximum(y, 0.0)
    return y


if __name__ == "__main__":
    key = jax.random.PRNGKey(0)
    kx1, kx2, kp1, kp3, kp3b = jax.random.split(key, 5)

    N, Cin, H, W, Cout = 2, 4, 16, 16, 128
    x = jax.random.normal(kx1, (N, Cin, H, W), jnp.float32)

    # ConvModule(4, 128)                   -> 1x1 conv + BN + ReLU (module defaults)
    p1 = make_conv_module_params(kp1, Cin, Cout, k=1)
    y1 = conv_module_forward(p1, x, k=1, s=1, p=0, act=True)

    # ConvModule(4, 128, k=3, p=1)         -> 3x3 conv + BN + ReLU (fat-K im2col path)
    p3 = make_conv_module_params(kp3, Cin, Cout, k=3)
    y3 = conv_module_forward(p3, x, k=3, s=1, p=1, act=True)

    # ConvModule(128, 128, k=3, s=2, p=1, act=False) -> large-Cin Pallas path + stride
    Cin_b, Hb, Wb = 128, 8, 8
    xb = jax.random.normal(kx2, (N, Cin_b, Hb, Wb), jnp.float32)
    p3b = make_conv_module_params(kp3b, Cin_b, Cout, k=3)
    y3b = conv_module_forward(p3b, xb, k=3, s=2, p=1, act=False)

    y1, y3, y3b = jax.block_until_ready((y1, y3, y3b))
    assert y1.shape == (N, Cout, H, W), y1.shape
    assert y3.shape == (N, Cout, H, W), y3.shape
    assert y3b.shape == (N, Cout, 4, 4), y3b.shape
    for y in (y1, y3, y3b):
        assert bool(jnp.all(jnp.isfinite(y)))

    r1 = _reference_forward(p1, x, k=1, s=1, p=0, act=True)
    r3 = _reference_forward(p3, x, k=3, s=1, p=1, act=True)
    r3b = _reference_forward(p3b, xb, k=3, s=2, p=1, act=False)
    # bf16 output stores -> tolerance re-validated (~bf16 eps * |y| on top of the
    # shared bf16 input/weight quantization of kernel and reference).
    for y, r in ((y1, r1), (y3, r3), (y3b, r3b)):
        assert jnp.allclose(y, r, atol=5e-2, rtol=5e-2), float(jnp.max(jnp.abs(y - r)))

    print("KERNEL_OK")
</pallas_src>

<mosaic_0001>
module attributes {stable_mosaic.version = 11 : i64} {
  func.func @_matmul_bn_act_kernel(%arg0: i32, %arg1: i32, %arg2: memref<256x4xbf16, #tpu.memory_space<vmem>>, %arg3: memref<4x128xbf16, #tpu.memory_space<vmem>>, %arg4: memref<1x128xf32, #tpu.memory_space<vmem>>, %arg5: memref<1x128xf32, #tpu.memory_space<vmem>>, %arg6: memref<256x128xbf16, #tpu.memory_space<vmem>>) attributes {dimension_semantics = [#tpu.dimension_semantics<parallel>, #tpu.dimension_semantics<parallel>], iteration_bounds = array<i64: 2, 1>, scalar_prefetch = 0 : i64, scratch_operands = 0 : i64, tpu.core_type = #tpu.core_type<tc>, window_params = [{transform_indices = @transform_0, window_bounds = array<i64: 256, 4>}, {transform_indices = @transform_1, window_bounds = array<i64: 4, 128>}, {transform_indices = @transform_2, window_bounds = array<i64: 1, 128>}, {transform_indices = @transform_3, window_bounds = array<i64: 1, 128>}, {transform_indices = @transform_4, window_bounds = array<i64: 256, 128>}]} {
    %c0 = arith.constant 0 : index
    %c0_0 = arith.constant 0 : index
    %0 = vector.load %arg2[%c0, %c0_0] : memref<256x4xbf16, #tpu.memory_space<vmem>>, vector<256x4xbf16>
    %c0_1 = arith.constant 0 : index
    %c0_2 = arith.constant 0 : index
    %1 = vector.load %arg3[%c0_1, %c0_2] : memref<4x128xbf16, #tpu.memory_space<vmem>>, vector<4x128xbf16>
    %cst = arith.constant dense<0.000000e+00> : vector<256x128xf32>
    %2 = tpu.matmul %0, %1, %cst {dimension_numbers = #tpu.dot_dimension_numbers<[1], [0], [0], [1], [0, 0, 1, 1], [], []>} : vector<256x4xbf16>, vector<4x128xbf16>, vector<256x128xf32> -> vector<256x128xf32>
    %c0_3 = arith.constant 0 : index
    %c0_4 = arith.constant 0 : index
    %3 = vector.load %arg4[%c0_3, %c0_4] : memref<1x128xf32, #tpu.memory_space<vmem>>, vector<1x128xf32>
    %4 = vector.broadcast %3 : vector<1x128xf32> to vector<256x128xf32>
    %5 = arith.mulf %2, %4 : vector<256x128xf32>
    %c0_5 = arith.constant 0 : index
    %c0_6 = arith.constant 0 : index
    %6 = vector.load %arg5[%c0_5, %c0_6] : memref<1x128xf32, #tpu.memory_space<vmem>>, vector<1x128xf32>
    %7 = vector.broadcast %6 : vector<1x128xf32> to vector<256x128xf32>
    %8 = arith.addf %5, %7 : vector<256x128xf32>
    %cst_7 = arith.constant 0.000000e+00 : f32
    %9 = vector.broadcast %cst_7 : f32 to vector<256x128xf32>
    %10 = arith.maximumf %8, %9 : vector<256x128xf32>
    %11 = arith.truncf %10 : vector<256x128xf32> to vector<256x128xbf16>
    %c0_8 = arith.constant 0 : index
    %c0_9 = arith.constant 0 : index
    %12 = vector.load %arg6[%c0_8, %c0_9] : memref<256x128xbf16, #tpu.memory_space<vmem>>, vector<256x128xbf16>
    tpu.vector_store %arg6[%c0_8, %c0_9], %11 {strides = array<i32>} : memref<256x128xbf16, #tpu.memory_space<vmem>>, vector<256x128xbf16>,
    return
  }
  func.func @transform_0(%arg0: i32, %arg1: i32) -> (i32, i32) {
    %c0_i32 = arith.constant 0 : i32
    %c0_i32_0 = arith.constant 0 : i32
    return %arg0, %c0_i32 : i32, i32
  }
  func.func @transform_1(%arg0: i32, %arg1: i32) -> (i32, i32) {
    %c0_i32 = arith.constant 0 : i32
    %c0_i32_0 = arith.constant 0 : i32
    return %c0_i32, %arg1 : i32, i32
  }
  func.func @transform_2(%arg0: i32, %arg1: i32) -> (i32, i32) {
    %c0_i32 = arith.constant 0 : i32
    %c0_i32_0 = arith.constant 0 : i32
    return %c0_i32, %arg1 : i32, i32
  }
  func.func @transform_3(%arg0: i32, %arg1: i32) -> (i32, i32) {
    %c0_i32 = arith.constant 0 : i32
    %c0_i32_0 = arith.constant 0 : i32
    return %c0_i32, %arg1 : i32, i32
  }
  func.func @transform_4(%arg0: i32, %arg1: i32) -> (i32, i32) {
    %c0_i32 = arith.constant 0 : i32
    return %arg0, %arg1 : i32, i32
  }
}

</mosaic_0001>

<bundles_post_ra>
// kernel: tpu_custom_call.1
= control target key start
LH: loop header
LB: loop body
LE: loop exit
PB: predicated region body
PF: predicated region fallthrough
CT: control target
= control target key end

     0   :  { %9 = vsyncpa [#allocation3], 0  ;;  %s1399_s0 = inlined_call_operand.vmem [shape: bf16[512,4], index: 0, kind: input, shape index: {}]   ;;  %s1400_s1 = inlined_call_operand.vmem [shape: bf16[4,128], index: 1, kind: input, shape index: {}]   ;;  %s1401_s2 = inlined_call_operand.vmem [shape: f32[1,128], index: 2, kind: input, shape index: {}]   ;;  %s1402_s3 = inlined_call_operand.vmem [shape: f32[1,128], index: 3, kind: input, shape index: {}]   ;;  %s1403_s4 = inlined_call_operand.hbm [shape: bf16[512,128], index: 4, kind: output, shape index: {}]  }
   0x1   :  { %11 = vsyncpa [#allocation3 + $0x1], 0  ;;  %s1187_s15 = smov 0   ;;  %s1189_s16 = smov 0  }
   0x2   :  { %s1191_s17 = smov 0   ;;  %s1193_s18 = smov 0  }
   0x3   :  { %s1195_s19 = smov 0   ;;  %s1197_s20 = smov 0  }
   0x4 LB: > { %s810_s21 = sadd.s32 4294967295, %s1158_s20   ;;  %s811_s22 = sadd.s32 4294967294, %s1158_s20   ;;  %s1158_s20 = sphi %s1197_s20, %s17_s20   ;;  %s1154_s19 = sphi %s1195_s19, %s1410_s19   ;;  %s1150_s18 = sphi %s1193_s18, %s1409_s18   ;;  %s1146_s17 = sphi %s1191_s17, %s1408_s17   ;;  %s1142_s16 = sphi %s1189_s16, %s1407_s16   ;;  %s1138_s15 = sphi %s1187_s15, %s1406_s15  }
   0x5   : > { %s29_s23 = sadd.s32 1, %s1154_s19  ;;  %s142_s24 = sadd.s32 1, %s1146_s17 }
   0x6   : > { %p31_p0 = scmp.ge.s32.totalorder %s29_s23, 2  ;;  %p152_p1 = scmp.ne.s32.totalorder %s1146_s17, %s1142_s16 }
   0x7   : > { %p153_p2 = scmp.eq.s32.totalorder %s810_s21, 1  ;;  %p158_p3 = scmp.ne.s32.totalorder %s1142_s16, %s1138_s15 }
   0x8   : > { %s1412_s23 = smov (%p31_p0, %s29_s23), 0  ;;  %p159_p5 = scmp.eq.s32.totalorder %s811_s22, 1 }
   0x9   : > { %p1227_p4 = por %p153_p2, %p152_p1  ;;  %s137_s26 = ssub.s32 %s1154_s19, %s1412_s23 }
   0xa   : > { %p817_p6 = scmp.ge.s32.totalorder %s1158_s20, 1  ;;  %p140_p7 = scmp.eq.s32.totalorder %s137_s26, 0 }
   0xb   : > { %p1234_p8 = por %p159_p5, %p158_p3  ;;  %p205_p9 = scmp.lt.s32.totalorder %s1158_s20, 3 }
   0xc   : > { %s1240_s28 = scalar_select %p140_p7, %s1146_s17, %s142_s24  }
   0xd   : > { %p206_p10 = pnand %p817_p6, %p205_p9 }
   0xe   : > { %s819_s5 = sshll.u32 (!%p206_p10), %s1150_s18, 5  ;;  %s238_s14 = sand.u32 (!%p206_p10), 1, %s1142_s16  }
   0xf   : > { %209 = sbr.rel (%p206_p10) target bundleno = 227 (0xe3), region = 36  ;;  %p242_p11 = scmp.lt.s32.totalorder (!%p206_p10), %s819_s5, 63 }
  0x10   : > { %s818_s21 = sshll.u32 (!%p206_p10), %s238_s14, 7  ;;  %s922_s24 = sshll.u32 (!%p206_p10), %s1150_s18, 7 }
  0x11   : > { %s1292_s22 = scalar_lea.vmem (!%p206_p10), [#allocation2], %s818_s21  ;;  %s695_s30 = scalar_lea.hbm (!%p206_p10), %s1403_s4, %s922_s24 }
  0x12   : > { %s696_s18 = sshll.u32 (!%p206_p10), %s1292_s22, 4  ;;  %s1100_s11 = scalar_lea.hbm (!%p206_p10), %s1403_s4, 256  ;;  %s697_s18 = int_to_ptr.vmem [resolvable:$true] %s696_s18 }
  0x14   : > { %v291_v0 = vld [vmem:[%s1400_s1] sm:$0x3]  ;;  %vm421_vm0 = vcmask 1041408   ;;  %s1414_s5 = smov (!%p242_p11, %s819_s5), 63  ;;  %vm372_vm1 = vcmask 31744  }
  0x15   : > { %v423_v1 = vsel %vm421_vm0, %v291_v0, 0  ;;  %s820_s6 = sshll.u32 %s1414_s5, 2  ;;  %v1268_v20 = vld [vmem:[%s1401_s2] ss:$0 sm:$0xff]  ;;  %s698_s5 = sshll.u32 %s695_s30, 4  ;;  %s699_s5 = int_to_ptr.hbm [resolvable:$true] %s698_s5 }
  0x16   : > { %432 = vmatpush.bf16.msra.mxu0 %v423_v1  ;;  %1018 = vmatpush.bf16.msra.mxu1 %v423_v1  ;;  %s245_s9 = scalar_lea.vmem %s1399_s0, %s820_s6  ;;  %v1274_v22 = vld [vmem:[%s1402_s3] ss:$0 sm:$0xff]  ;;  %s683_s6 = scalar_lea.sflag [#allocation3], %s238_s14 }
  0x17   : > { %1019 = vmatpush.bf16.msra.mxu2 %v423_v1  ;;  %1020 = vmatpush.bf16.msra.mxu3 %v423_v1  ;;  %v906_v2 = vld [vmem:[%s245_s9] sm:$0xff]  ;;  %v907_v6 = vld [vmem:[%s245_s9 + $0x8] sm:$0xff]  ;;  %v908_v10 = vld [vmem:[%s245_s9 + $0x10] sm:$0xff]  ;;  %s1094_s7 = sshra.s32 %s699_s5, 4  ;;  %s1095_s7 = int_to_ptr.hbm [resolvable:$true] %s1094_s7 }
  0x18   : > { %v910_v3 = vld [vmem:[%s245_s9 + $0x20] sm:$0xff]  ;;  %v911_v7 = vld [vmem:[%s245_s9 + $0x28] sm:$0xff]  ;;  %v912_v11 = vld [vmem:[%s245_s9 + $0x30] sm:$0xff]  ;;  %s1096_s8 = scalar_lea.hbm %s1095_s7, 128  ;;  %p1101_p1 = scmp.lt.s32.totalorder %s1095_s7, %s1403_s4 }
  0x19   : > { %v914_v4 = vld [vmem:[%s245_s9 + $0x40] sm:$0xff]  ;;  %885 = vmatmul.msk.bf16.vlgmr.msra.gmra.mxu0 %vm372_vm1, %v906_v2  ;;  %889 = vmatmul.msk.bf16.vlgmr.msra.gmra.mxu1 %vm372_vm1, %v910_v3  ;;  %v915_v8 = vld [vmem:[%s245_s9 + $0x48] sm:$0xff]  ;;  %v916_v12 = vld [vmem:[%s245_s9 + $0x50] sm:$0xff]  ;;  %p1097_p12 = scmp.ne.s32.totalorder %s1095_s7, %s1096_s8  ;;  %p1102_p2 = scmp.lt.s32.totalorder %s1100_s11, %s1096_s8 }
  0x1a   : > { %v918_v5 = vld [vmem:[%s245_s9 + $0x60] sm:$0xff]  ;;  %893 = vmatmul.msk.bf16.vlgmr.msra.gmra.mxu2 %vm372_vm1, %v914_v4  ;;  %v919_v9 = vld [vmem:[%s245_s9 + $0x68] sm:$0xff]  ;;  %v920_v13 = vld [vmem:[%s245_s9 + $0x70] sm:$0xff] }
  0x1b   : > { %897 = vmatmul.msk.bf16.vlgmr.msra.gmra.mxu3 %vm372_vm1, %v918_v5  ;;  %v909_v14 = vld [vmem:[%s245_s9 + $0x18] sm:$0xff]  ;;  %p1098_p13 = pnand %p1097_p12, %p1227_p4  ;;  %p1103_p3 = por %p1102_p2, %p1101_p1 }
  0x1c   : > { %v913_v15 = vld [vmem:[%s245_s9 + $0x38] sm:$0xff] }
  0x1d   : > { %v917_v16 = vld [vmem:[%s245_s9 + $0x58] sm:$0xff]  ;;  %p1099_p0 = pneg %p1098_p13 }
  0x1e   : > { %v921_v17 = vld [vmem:[%s245_s9 + $0x78] sm:$0xff] }
  0x1f   : > { %p1104_p5 = pnand %p1103_p3, %p1099_p0 }
  0x29   : > { %886 = vmatmul.msk.bf16.gmra.mxu0 %vm372_vm1, %v907_v6  ;;  %890 = vmatmul.msk.bf16.gmra.mxu1 %vm372_vm1, %v911_v7 }
  0x2a   : > { %894 = vmatmul.msk.bf16.gmra.mxu2 %vm372_vm1, %v915_v8 }
  0x2b   : > { %898 = vmatmul.msk.bf16.gmra.mxu3 %vm372_vm1, %v919_v9 }
  0x39   : > { %887 = vmatmul.msk.bf16.gmra.mxu0 %vm372_vm1, %v908_v10  ;;  %891 = vmatmul.msk.bf16.gmra.mxu1 %vm372_vm1, %v912_v11 }
  0x3a   : > { %895 = vmatmul.msk.bf16.gmra.mxu2 %vm372_vm1, %v916_v12 }
  0x3b   : > { %899 = vmatmul.msk.bf16.gmra.mxu3 %vm372_vm1, %v920_v13 }
  0x49   : > { %888 = vmatmul.msk.bf16.gmra.mxu0 %vm372_vm1, %v909_v14  ;;  %892 = vmatmul.msk.bf16.gmra.mxu1 %vm372_vm1, %v913_v15 }
  0x4a   : > { %896 = vmatmul.msk.bf16.gmra.mxu2 %vm372_vm1, %v917_v16 }
  0x4b   : > { %900 = vmatmul.msk.bf16.gmra.mxu3 %vm372_vm1, %v921_v17 }
  0x96   : > { %v434_v18 = vpop.f32.mrf.mxu0  ;;  %v454_v19 = vpop.f32.mrf.mxu1 }
  0x97   : > { %v518_v21 = vmul.f32 %v1268_v20, %v434_v18  ;;  %v526_v23 = vmul.f32 %v1268_v20, %v454_v19 }
  0x99   : > { %v554_v28 = vadd.f32 %v1274_v22, %v518_v21  ;;  %v562_v29 = vadd.f32 %v1274_v22, %v526_v23 }
  0x9b   : > { %v586_v36 = vmax.f32 %v554_v28, 0.0  ;;  %v594_v37 = vmax.f32 %v562_v29, 0.0 }
  0x9d   : > { %v474_v24 = vpop.f32.mrf.mxu2 }
  0x9e   : > { %v494_v25 = vpop.f32.mrf.mxu3  ;;  %v436_v26 = vpop.f32.mrf.mxu0  ;;  %v534_v34 = vmul.f32 %v1268_v20, %v474_v24 }
  0x9f   : > { %v456_v27 = vpop.f32.mrf.mxu1  ;;  %v519_v30 = vmul.f32 %v1268_v20, %v436_v26  ;;  %v542_v35 = vmul.f32 %v1268_v20, %v494_v25 }
  0xa0   : > { %v527_v31 = vmul.f32 %v1268_v20, %v456_v27  ;;  %v570_v44 = vadd.f32 %v1274_v22, %v534_v34 }
  0xa1   : > { %v555_v32 = vadd.f32 %v1274_v22, %v519_v30  ;;  %v578_v45 = vadd.f32 %v1274_v22, %v542_v35 }
  0xa2   : > { %v563_v33 = vadd.f32 %v1274_v22, %v527_v31  ;;  %v602_v52 = vmax.f32 %v570_v44, 0.0 }
  0xa3   : > { %v587_v38 = vmax.f32 %v555_v32, 0.0  ;;  %v610_v53 = vmax.f32 %v578_v45, 0.0 }
  0xa4   : > { %v595_v39 = vmax.f32 %v563_v33, 0.0 }
  0xa5   : > { %v926_v40 = vpack.c.bf16 %v587_v38, %v586_v36  ;;  %v476_v42 = vpop.f32.mrf.mxu2 }
  0xa6   : > { %v946_v41 = vpack.c.bf16 %v595_v39, %v594_v37  ;;  %v496_v43 = vpop.f32.mrf.mxu3  ;;  %v535_v46 = vmul.f32 %v1268_v20, %v476_v42  ;;  %v439_v48 = vpop.f32.mrf.mxu0 }
  0xa7   : > { %v543_v47 = vmul.f32 %v1268_v20, %v496_v43  ;;  %v459_v49 = vpop.f32.mrf.mxu1  ;;  %927 = vst [vmem:[%s1292_s22] sm:$0xff] %v926_v40   ;;  %v520_v56 = vmul.f32 %v1268_v20, %v439_v48 }
  0xa8   : > { %1006 = vst [vmem:[%s1292_s22 + $0x20] sm:$0xff] %v946_v41   ;;  %v571_v50 = vadd.f32 %v1274_v22, %v535_v46  ;;  %v528_v57 = vmul.f32 %v1268_v20, %v459_v49 }
  0xa9   : > { %v579_v51 = vadd.f32 %v1274_v22, %v543_v47  ;;  %v556_v0 = vadd.f32 %v1274_v22, %v520_v56 }
  0xaa   : > { %v603_v54 = vmax.f32 %v571_v50, 0.0  ;;  %v564_v1 = vadd.f32 %v1274_v22, %v528_v57 }
  0xab   : > { %v611_v55 = vmax.f32 %v579_v51, 0.0  ;;  %v588_v8 = vmax.f32 %v556_v0, 0.0 }
  0xac   : > { %v966_v58 = vpack.c.bf16 %v603_v54, %v602_v52  ;;  %v596_v9 = vmax.f32 %v564_v1, 0.0 }
  0xad   : > { %v986_v59 = vpack.c.bf16 %v611_v55, %v610_v53  ;;  %v479_v60 = vpop.f32.mrf.mxu2 }
  0xae   : > { %v499_v61 = vpop.f32.mrf.mxu3  ;;  %1010 = vst [vmem:[%s1292_s22 + $0x40] sm:$0xff] %v966_v58   ;;  %v441_v62 = vpop.f32.mrf.mxu0  ;;  %v536_v6 = vmul.f32 %v1268_v20, %v479_v60 }
  0xaf   : > { %v461_v63 = vpop.f32.mrf.mxu1  ;;  %1014 = vst [vmem:[%s1292_s22 + $0x60] sm:$0xff] %v986_v59   ;;  %v521_v2 = vmul.f32 %v1268_v20, %v441_v62  ;;  %v544_v7 = vmul.f32 %v1268_v20, %v499_v61 }
  0xb0   : > { %v529_v3 = vmul.f32 %v1268_v20, %v461_v63  ;;  %v572_v16 = vadd.f32 %v1274_v22, %v536_v6 }
  0xb1   : > { %v557_v4 = vadd.f32 %v1274_v22, %v521_v2  ;;  %v580_v17 = vadd.f32 %v1274_v22, %v544_v7 }
  0xb2   : > { %v565_v5 = vadd.f32 %v1274_v22, %v529_v3  ;;  %v604_v26 = vmax.f32 %v572_v16, 0.0 }
  0xb3   : > { %v589_v10 = vmax.f32 %v557_v4, 0.0  ;;  %v612_v27 = vmax.f32 %v580_v17, 0.0 }
  0xb4   : > { %v597_v11 = vmax.f32 %v565_v5, 0.0 }
  0xb5   : > { %v931_v12 = vpack.c.bf16 %v589_v10, %v588_v8  ;;  %v481_v14 = vpop.f32.mrf.mxu2 }
  0xb6   : > { %v951_v13 = vpack.c.bf16 %v597_v11, %v596_v9  ;;  %v501_v15 = vpop.f32.mrf.mxu3  ;;  %v537_v18 = vmul.f32 %v1268_v20, %v481_v14  ;;  %v444_v21 = vpop.f32.mrf.mxu0 }
  0xb7   : > { %v545_v19 = vmul.f32 %v1268_v20, %v501_v15  ;;  %v464_v23 = vpop.f32.mrf.mxu1  ;;  %1003 = vst [vmem:[%s1292_s22 + $0x8] sm:$0xff] %v931_v12   ;;  %v522_v30 = vmul.f32 %v1268_v20, %v444_v21 }
  0xb8   : > { %1007 = vst [vmem:[%s1292_s22 + $0x28] sm:$0xff] %v951_v13   ;;  %v573_v24 = vadd.f32 %v1274_v22, %v537_v18  ;;  %v530_v31 = vmul.f32 %v1268_v20, %v464_v23 }
  0xb9   : > { %v581_v25 = vadd.f32 %v1274_v22, %v545_v19  ;;  %v558_v38 = vadd.f32 %v1274_v22, %v522_v30 }
  0xba   : > { %v605_v28 = vmax.f32 %v573_v24, 0.0  ;;  %v566_v39 = vadd.f32 %v1274_v22, %v530_v31 }
  0xbb   : > { %v613_v29 = vmax.f32 %v581_v25, 0.0  ;;  %v590_v46 = vmax.f32 %v558_v38, 0.0 }
  0xbc   : > { %v971_v32 = vpack.c.bf16 %v605_v28, %v604_v26  ;;  %v598_v47 = vmax.f32 %v566_v39, 0.0 }
  0xbd   : > { %v991_v33 = vpack.c.bf16 %v613_v29, %v612_v27  ;;  %v484_v34 = vpop.f32.mrf.mxu2 }
  0xbe   : > { %v504_v35 = vpop.f32.mrf.mxu3  ;;  %1011 = vst [vmem:[%s1292_s22 + $0x48] sm:$0xff] %v971_v32   ;;  %v446_v36 = vpop.f32.mrf.mxu0  ;;  %v538_v44 = vmul.f32 %v1268_v20, %v484_v34 }
  0xbf   : > { %v466_v37 = vpop.f32.mrf.mxu1  ;;  %1015 = vst [vmem:[%s1292_s22 + $0x68] sm:$0xff] %v991_v33   ;;  %v523_v40 = vmul.f32 %v1268_v20, %v446_v36  ;;  %v546_v45 = vmul.f32 %v1268_v20, %v504_v35 }
  0xc0   : > { %v531_v41 = vmul.f32 %v1268_v20, %v466_v37  ;;  %v574_v54 = vadd.f32 %v1274_v22, %v538_v44 }
  0xc1   : > { %v559_v42 = vadd.f32 %v1274_v22, %v523_v40  ;;  %v582_v55 = vadd.f32 %v1274_v22, %v546_v45 }
  0xc2   : > { %v567_v43 = vadd.f32 %v1274_v22, %v531_v41  ;;  %v606_v62 = vmax.f32 %v574_v54, 0.0 }
  0xc3   : > { %v591_v48 = vmax.f32 %v559_v42, 0.0  ;;  %v614_v63 = vmax.f32 %v582_v55, 0.0 }
  0xc4   : > { %v599_v49 = vmax.f32 %v567_v43, 0.0 }
  0xc5   : > { %v936_v50 = vpack.c.bf16 %v591_v48, %v590_v46  ;;  %v486_v52 = vpop.f32.mrf.mxu2 }
  0xc6   : > { %v956_v51 = vpack.c.bf16 %v599_v49, %v598_v47  ;;  %v506_v53 = vpop.f32.mrf.mxu3  ;;  %v539_v56 = vmul.f32 %v1268_v20, %v486_v52  ;;  %v449_v58 = vpop.f32.mrf.mxu0 }
  0xc7   : > { %v547_v57 = vmul.f32 %v1268_v20, %v506_v53  ;;  %v469_v59 = vpop.f32.mrf.mxu1  ;;  %1004 = vst [vmem:[%s1292_s22 + $0x10] sm:$0xff] %v936_v50   ;;  %v524_v2 = vmul.f32 %v1268_v20, %v449_v58 }
  0xc8   : > { %1008 = vst [vmem:[%s1292_s22 + $0x30] sm:$0xff] %v956_v51   ;;  %v575_v60 = vadd.f32 %v1274_v22, %v539_v56  ;;  %v532_v3 = vmul.f32 %v1268_v20, %v469_v59 }
  0xc9   : > { %v583_v61 = vadd.f32 %v1274_v22, %v547_v57  ;;  %v560_v10 = vadd.f32 %v1274_v22, %v524_v2 }
  0xca   : > { %v607_v0 = vmax.f32 %v575_v60, 0.0  ;;  %v568_v11 = vadd.f32 %v1274_v22, %v532_v3 }
  0xcb   : > { %v615_v1 = vmax.f32 %v583_v61, 0.0  ;;  %v592_v18 = vmax.f32 %v560_v10, 0.0 }
  0xcc   : > { %v976_v4 = vpack.c.bf16 %v607_v0, %v606_v62  ;;  %v600_v19 = vmax.f32 %v568_v11, 0.0 }
  0xcd   : > { %v996_v5 = vpack.c.bf16 %v615_v1, %v614_v63  ;;  %v489_v6 = vpop.f32.mrf.mxu2 }
  0xce   : > { %v509_v7 = vpop.f32.mrf.mxu3  ;;  %1012 = vst [vmem:[%s1292_s22 + $0x50] sm:$0xff] %v976_v4   ;;  %v451_v8 = vpop.f32.mrf.mxu0  ;;  %v540_v16 = vmul.f32 %v1268_v20, %v489_v6 }
  0xcf   : > { %v471_v9 = vpop.f32.mrf.mxu1  ;;  %1016 = vst [vmem:[%s1292_s22 + $0x70] sm:$0xff] %v996_v5   ;;  %v525_v12 = vmul.f32 %v1268_v20, %v451_v8  ;;  %v548_v17 = vmul.f32 %v1268_v20, %v509_v7 }
  0xd0   : > { %v533_v13 = vmul.f32 %v1268_v20, %v471_v9  ;;  %v576_v28 = vadd.f32 %v1274_v22, %v540_v16 }
  0xd1   : > { %v561_v14 = vadd.f32 %v1274_v22, %v525_v12  ;;  %v584_v29 = vadd.f32 %v1274_v22, %v548_v17 }
  0xd2   : > { %v569_v15 = vadd.f32 %v1274_v22, %v533_v13  ;;  %v608_v34 = vmax.f32 %v576_v28, 0.0 }
  0xd3   : > { %v593_v21 = vmax.f32 %v561_v14, 0.0  ;;  %v616_v35 = vmax.f32 %v584_v29, 0.0 }
  0xd4   : > { %v601_v23 = vmax.f32 %v569_v15, 0.0 }
  0xd5   : > { %v941_v24 = vpack.c.bf16 %v593_v21, %v592_v18  ;;  %v491_v26 = vpop.f32.mrf.mxu2 }
  0xd6   : > { %v961_v25 = vpack.c.bf16 %v601_v23, %v600_v19  ;;  %v511_v27 = vpop.f32.mrf.mxu3  ;;  %v541_v30 = vmul.f32 %v1268_v20, %v491_v26 }
  0xd7   : > { %v549_v31 = vmul.f32 %v1268_v20, %v511_v27  ;;  %1005 = vst [vmem:[%s1292_s22 + $0x18] sm:$0xff] %v941_v24  }
  0xd8   : > { %1009 = vst [vmem:[%s1292_s22 + $0x38] sm:$0xff] %v961_v25   ;;  %v577_v32 = vadd.f32 %v1274_v22, %v541_v30 }
  0xd9   : > { %v585_v33 = vadd.f32 %v1274_v22, %v549_v31 }
  0xda   : > { %v609_v36 = vmax.f32 %v577_v32, 0.0 }
  0xdb   : > { %v617_v20 = vmax.f32 %v585_v33, 0.0 }
  0xdc   : > { %v981_v37 = vpack.c.bf16 %v609_v36, %v608_v34 }
  0xdd   : > { %v1001_v38 = vpack.c.bf16 %v617_v20, %v616_v35 }
  0xde   : > { %1013 = vst [vmem:[%s1292_s22 + $0x58] sm:$0xff] %v981_v37  }
  0xdf   : > { %1017 = vst [vmem:[%s1292_s22 + $0x78] sm:$0xff] %v1001_v38  }
  0xe0   : > { %1107 = shalt.err (!%p1104_p5)
}
  0xe1   : > { %s1160_s14 = smov 64   ;;  %s1161_s21 = smov 4  }
  0xe2   : > { %1021 = dma.vmem_to_hbm [thread:$0]  (%p1227_p4), %s697_s18, 2048, %s699_s5, %s683_s6, %s1160_s14, %s1160_s14, %s1161_s21  }
  0xe3 PF: > { %p1027_p6 = scmp.ge.s32.totalorder %s1158_s20, 2  ;;  %s713_s22 = sand.u32 1, %s1138_s15  }
  0xe4   : > { %s714_s24 = scalar_lea.sflag [#allocation3], %s713_s22 }
  0xe5   : > { %p1024_p7 = pnand %p1027_p6, %p1234_p8 }
  0xe7   : > { %p1025_p9 = pneg %p1024_p7 }
  0xe9   : > { %1133 = dma.done.wait (%p1025_p9), %s714_s24, 2048  }
  0xea   : > { %1135 = vsyncadd (%p1025_p9), %s714_s24, 4294965248  ;;  %s17_s20 = sadd.s32 1, %s1158_s20   ;;  %s1406_s15 = smov %s1142_s16 }
  0xeb   : > { %p14_p10 = scmp.ge.s32.totalorder %s17_s20, 4   ;;  %s1407_s16 = smov %s1146_s17 }
  0xec   : > { %s1408_s17 = smov %s1240_s28  ;;  %s1409_s18 = smov %s1154_s19 }
  0xed   : > { %s1410_s19 = smov %s1412_s23  ;;  %16 = sbr.rel (!%p14_p10) target bundleno = 4 (0x4), region = 80 }
  0xf2   :  { %720 = vsyncpa [#allocation3], 1 }
  0xf3   :  { %722 = vsyncpa [#allocation3 + $0x1], 1 }

</bundles_post_ra>
